<compile_context>
chip_gen: v6e
topology: v6e:2x2x1
jax: 0.10.0
libtpu: 0.0.40
codegen_flags: <defaults>
</compile_context>

<pallas_src>
import functools

import jax
import jax.numpy as jnp
from jax import lax
from jax.experimental import pallas as pl
from jax.experimental.pallas import tpu as pltpu


def _round_up(n, m):
    return ((n + m - 1) // m) * m


def _linear_logsoftmax_kernel(x_ref, w_ref, b_ref, o_ref, acc_ref,
                              *, valid_v, tile_v, mask_v):
    k = pl.program_id(1)

    @pl.when(k == 0)
    def _():
        acc_ref[...] = jnp.zeros_like(acc_ref)

    x_t = x_ref[...]
    w_t = w_ref[...]
    if mask_v:
        # Ragged last V tile: out-of-bounds columns of the block contain
        # whatever was in the VMEM buffer (possibly NaN/Inf); zero both
        # operands so they contribute exactly nothing. (1, tile_v) mask keeps
        # the iota/compare cheap; the select broadcasts over rows.
        col = lax.broadcasted_iota(jnp.int32, (1, tile_v), 1) + k * tile_v
        valid = col < valid_v
        x_t = jnp.where(valid, x_t, 0)
        w_t = jnp.where(valid, w_t, 0)

    # Contraction over V with W kept [O, V] (lane-dense DMA layout); bf16
    # operands -> single-pass MXU, f32 accumulation.
    # TODO(synk): if a bundle dump shows an in-kernel vxpose of the W tile
    # contending with vmatmul on the vector-extended slot, pre-transpose W to
    # [V, O] once in the wrapper and switch dimension_numbers to ((1,),(0,)).
    acc_ref[...] += lax.dot_general(
        x_t.astype(jnp.bfloat16),
        w_t.astype(jnp.bfloat16),
        dimension_numbers=(((1,), (1,)), ((), ())),
        preferred_element_type=jnp.float32,
    )

    @pl.when(k == pl.num_programs(1) - 1)
    def _():
        logits = acc_ref[...] + b_ref[...]          # f32 bias
        m = jnp.max(logits, axis=-1, keepdims=True)
        shifted = logits - m
        lse = jnp.log(jnp.sum(jnp.exp(shifted), axis=-1, keepdims=True))
        o_ref[...] = (shifted - lse).astype(o_ref.dtype)


def linear_layperson_forward(x, weight, bias, *, block_b=None, tile_v=None,
                             target_x_tile_bytes=8 * 1024 * 1024):
    """x: [B, V]; weight: [O, V]; bias: [O] -> f32 log-probs [B, O]."""
    B, V = x.shape
    O = weight.shape[0]
    assert weight.shape == (O, V) and bias.shape == (O,)

    x_bytes = jnp.dtype(x.dtype).itemsize

    # ---- batch tiling: minimize pad waste; >=2 tiles for megacore ----------
    if block_b is None:
        max_block_b = 512
        num_b_tiles = pl.cdiv(B, max_block_b)
        if num_b_tiles == 1 and B >= 16:
            num_b_tiles = 2                       # keep v7x's 2nd TC busy
        block_b = _round_up(pl.cdiv(B, num_b_tiles), 8)
    else:
        block_b = _round_up(min(block_b, _round_up(B, 8)), 8)
    grid_b = pl.cdiv(B, block_b)
    Bp = grid_b * block_b

    # ---- vocab tiling: ~target bytes of x per grid step, lane-aligned ------
    if tile_v is None:
        tile_v = max(128, (target_x_tile_bytes // (x_bytes * block_b)) // 128 * 128)
    tile_v = max(128, (tile_v // 128) * 128)
    tile_v = min(tile_v, _round_up(V, 128))
    grid_v = pl.cdiv(V, tile_v)
    mask_v = (V % tile_v) != 0

    # W is tiny (O x V): cast to bf16 once so both its HBM re-stream (index_map
    # (0, k) re-fetches it per batch tile) and the MXU operand are bf16.
    # x stays in its input dtype in HBM -- a wrapper-side cast would add a full
    # extra read+write of the activation; the tile is cast in-kernel instead.
    w_bf16 = weight.astype(jnp.bfloat16)
    b2 = bias.reshape(1, O).astype(jnp.float32)

    # ---- VMEM budget derived from the double-buffered footprint ------------
    footprint = (2 * block_b * tile_v * x_bytes      # x double buffer
                 + 2 * O * tile_v * 2                # W double buffer (bf16)
                 + 2 * block_b * O * 4               # out double buffer
                 + block_b * O * 4                   # f32 accumulator
                 + 2 * 8 * 128 * 4)                  # bias block (padded)
    vmem_limit = int(min(max(2 * footprint, 24 << 20), 64 << 20))

    kernel = functools.partial(
        _linear_logsoftmax_kernel, valid_v=V, tile_v=tile_v, mask_v=mask_v)

    out = pl.pallas_call(
        kernel,
        out_shape=jax.ShapeDtypeStruct((Bp, O), jnp.float32),
        grid_spec=pltpu.PrefetchScalarGridSpec(
            num_scalar_prefetch=0,
            grid=(grid_b, grid_v),
            in_specs=[
                pl.BlockSpec((block_b, tile_v), lambda i, k: (i, k)),  # x
                pl.BlockSpec((O, tile_v), lambda i, k: (0, k)),        # W [O,V]
                pl.BlockSpec((1, O), lambda i, k: (0, 0)),             # bias
            ],
            out_specs=pl.BlockSpec((block_b, O), lambda i, k: (i, 0)),
            scratch_shapes=[pltpu.VMEM((block_b, O), jnp.float32)],
        ),
        compiler_params=pltpu.CompilerParams(
            dimension_semantics=("parallel", "arbitrary"),
            vmem_limit_bytes=vmem_limit,
        ),
    )(x, w_bf16, b2)

    return out[:B]


if __name__ == "__main__":
    key = jax.random.PRNGKey(0)
    kx, kw, kb = jax.random.split(key, 3)

    # Small shapes consistent with the module; B not a multiple of 8 and V not
    # a multiple of 128 so the ragged-batch and ragged-V paths are exercised.
    B, VOCAB_SIZE, OUTPUT_SIZE = 10, 400, 5

    bound = 1.0 / (VOCAB_SIZE ** 0.5)
    weight = jax.random.uniform(
        kw, (OUTPUT_SIZE, VOCAB_SIZE), jnp.float32, -bound, bound)
    bias = jax.random.uniform(kb, (OUTPUT_SIZE,), jnp.float32, -bound, bound)
    # Bag-of-words style input (non-negative counts-ish values).
    x = jax.random.uniform(kx, (B, VOCAB_SIZE), jnp.float32, 0.0, 2.0)

    # Small explicit tiles to exercise the V-reduction grid axis, the ragged-V
    # mask and the ragged-batch tile; real vocabularies use the auto sizing.
    y_small = linear_layperson_forward(x, weight, bias, block_b=8, tile_v=128)
    y_auto = linear_layperson_forward(x, weight, bias)
    y_small, y_auto = jax.block_until_ready((y_small, y_auto))

    # Reference matched to the kernel's bf16-operand / f32-accumulate matmul.
    logits_bf16 = jnp.dot(x.astype(jnp.bfloat16), weight.astype(jnp.bfloat16).T,
                          preferred_element_type=jnp.float32) + bias
    y_ref_bf16 = jax.nn.log_softmax(logits_bf16, axis=-1)
    # Module-semantics (full f32) reference, loose tolerance for bf16 operands.
    y_ref_f32 = jax.nn.log_softmax(x @ weight.T + bias, axis=-1)

    assert y_small.shape == (B, OUTPUT_SIZE) and y_auto.shape == (B, OUTPUT_SIZE)
    assert jnp.allclose(y_small, y_ref_bf16, atol=5e-4, rtol=1e-4)
    assert jnp.allclose(y_auto, y_ref_bf16, atol=5e-4, rtol=1e-4)
    assert jnp.allclose(y_small, y_ref_f32, atol=1e-1)
    assert jnp.allclose(y_auto, y_ref_f32, atol=1e-1)

    print("KERNEL_OK")
</pallas_src>

<mosaic_0001>
module attributes {stable_mosaic.version = 11 : i64} {
  func.func @_linear_logsoftmax_kernel(%arg0: i32, %arg1: i32, %arg2: memref<8x128xf32, #tpu.memory_space<vmem>>, %arg3: memref<5x128xbf16, #tpu.memory_space<vmem>>, %arg4: memref<1x5xf32, #tpu.memory_space<vmem>>, %arg5: memref<8x5xf32, #tpu.memory_space<vmem>>, %arg6: memref<8x5xf32, #tpu.memory_space<vmem>>) attributes {dimension_semantics = [#tpu.dimension_semantics<parallel>, #tpu.dimension_semantics<arbitrary>], iteration_bounds = array<i64: 2, 4>, scalar_prefetch = 0 : i64, scratch_operands = 1 : i64, tpu.core_type = #tpu.core_type<tc>, window_params = [{transform_indices = @transform_0, window_bounds = array<i64: 8, 128>}, {transform_indices = @transform_1, window_bounds = array<i64: 5, 128>}, {pipeline_mode = #tpu.pipeline_mode<synchronous>, transform_indices = @transform_2, window_bounds = array<i64: 1, 5>}, {transform_indices = @transform_3, window_bounds = array<i64: 8, 5>}]} {
    %c0_i32 = arith.constant 0 : i32
    %0 = arith.cmpi eq, %arg1, %c0_i32 : i32
    %1 = arith.extui %0 : i1 to i32
    %c0_i32_0 = arith.constant 0 : i32
    %2 = arith.cmpi ne, %1, %c0_i32_0 : i32
    scf.if %2 {
      %cst_11 = arith.constant 0.000000e+00 : f32
      %29 = vector.broadcast %cst_11 : f32 to vector<8x5xf32>
      %c0_12 = arith.constant 0 : index
      %c0_13 = arith.constant 0 : index
      %30 = vector.load %arg6[%c0_12, %c0_13] : memref<8x5xf32, #tpu.memory_space<vmem>>, vector<8x5xf32>
      tpu.vector_store %arg6[%c0_12, %c0_13], %29 {strides = array<i32>} : memref<8x5xf32, #tpu.memory_space<vmem>>, vector<8x5xf32>,
    } else {
    }
    %c0 = arith.constant 0 : index
    %c0_1 = arith.constant 0 : index
    %3 = vector.load %arg2[%c0, %c0_1] : memref<8x128xf32, #tpu.memory_space<vmem>>, vector<8x128xf32>
    %c0_2 = arith.constant 0 : index
    %c0_3 = arith.constant 0 : index
    %4 = vector.load %arg3[%c0_2, %c0_3] : memref<5x128xbf16, #tpu.memory_space<vmem>>, vector<5x128xbf16>
    %5 = tpu.iota {dimensions = array<i32: 1>} : vector<1x128xi32>
    %c128_i32 = arith.constant 128 : i32
    %6 = arith.muli %arg1, %c128_i32 : i32
    %7 = vector.broadcast %6 : i32 to vector<1x128xi32>
    %8 = arith.addi %5, %7 : vector<1x128xi32>
    %c400_i32 = arith.constant 400 : i32
    %9 = vector.broadcast %c400_i32 : i32 to vector<1x128xi32>
    %10 = arith.cmpi slt, %8, %9 : vector<1x128xi32>
    %c0_i32_4 = arith.constant 0 : i32
    %11 = arith.sitofp %c0_i32_4 : i32 to f32
    %12 = vector.shape_cast %10 : vector<1x128xi1> to vector<1x128xi1>
    %13 = vector.broadcast %12 : vector<1x128xi1> to vector<8x128xi1>
    %14 = vector.broadcast %11 : f32 to vector<8x128xf32>
    %15 = arith.select %13, %3, %14 : vector<8x128xi1>, vector<8x128xf32>
    %c0_i32_5 = arith.constant 0 : i32
    %16 = arith.sitofp %c0_i32_5 : i32 to bf16
    %17 = vector.shape_cast %10 : vector<1x128xi1> to vector<1x128xi1>
    %18 = vector.broadcast %17 : vector<1x128xi1> to vector<5x128xi1>
    %19 = vector.broadcast %16 : bf16 to vector<5x128xbf16>
    %20 = arith.select %18, %4, %19 : vector<5x128xi1>, vector<5x128xbf16>
    %c0_6 = arith.constant 0 : index
    %c0_7 = arith.constant 0 : index
    %21 = vector.load %arg6[%c0_6, %c0_7] : memref<8x5xf32, #tpu.memory_space<vmem>>, vector<8x5xf32>
    %22 = arith.truncf %15 : vector<8x128xf32> to vector<8x128xbf16>
    %cst = arith.constant dense<0.000000e+00> : vector<8x5xf32>
    %23 = tpu.matmul %22, %20, %cst {dimension_numbers = #tpu.dot_dimension_numbers<[1], [1], [0], [0], [0, 0, 1, 0], [], []>} : vector<8x128xbf16>, vector<5x128xbf16>, vector<8x5xf32> -> vector<8x5xf32>
    %24 = arith.addf %21, %23 : vector<8x5xf32>
    %c0_8 = arith.constant 0 : index
    %c0_9 = arith.constant 0 : index
    %25 = vector.load %arg6[%c0_8, %c0_9] : memref<8x5xf32, #tpu.memory_space<vmem>>, vector<8x5xf32>
    tpu.vector_store %arg6[%c0_8, %c0_9], %24 {strides = array<i32>} : memref<8x5xf32, #tpu.memory_space<vmem>>, vector<8x5xf32>,
    %c3_i32 = arith.constant 3 : i32
    %26 = arith.cmpi eq, %arg1, %c3_i32 : i32
    %27 = arith.extui %26 : i1 to i32
    %c0_i32_10 = arith.constant 0 : i32
    %28 = arith.cmpi ne, %27, %c0_i32_10 : i32
    scf.if %28 {
      %c0_11 = arith.constant 0 : index
      %c0_12 = arith.constant 0 : index
      %29 = vector.load %arg6[%c0_11, %c0_12] : memref<8x5xf32, #tpu.memory_space<vmem>>, vector<8x5xf32>
      %c0_13 = arith.constant 0 : index
      %c0_14 = arith.constant 0 : index
      %30 = vector.load %arg4[%c0_13, %c0_14] : memref<1x5xf32, #tpu.memory_space<vmem>>, vector<1x5xf32>
      %31 = vector.broadcast %30 : vector<1x5xf32> to vector<8x5xf32>
      %32 = arith.addf %29, %31 : vector<8x5xf32>
      %cst_15 = arith.constant dense<0xFF800000> : vector<8xf32>
      %33 = vector.multi_reduction <maximumf>, %32, %cst_15 [1] : vector<8x5xf32> to vector<8xf32>
      %34 = vector.shape_cast %33 : vector<8xf32> to vector<8x1xf32>
      %35 = vector.broadcast %34 : vector<8x1xf32> to vector<8x5xf32>
      %36 = arith.subf %32, %35 : vector<8x5xf32>
      %37 = math.exp %36 : vector<8x5xf32>
      %cst_16 = arith.constant dense<0.000000e+00> : vector<8xf32>
      %38 = vector.multi_reduction <add>, %37, %cst_16 [1] : vector<8x5xf32> to vector<8xf32>
      %39 = vector.shape_cast %38 : vector<8xf32> to vector<8x1xf32>
      %40 = math.log %39 : vector<8x1xf32>
      %41 = vector.broadcast %40 : vector<8x1xf32> to vector<8x5xf32>
      %42 = arith.subf %36, %41 : vector<8x5xf32>
      %c0_17 = arith.constant 0 : index
      %c0_18 = arith.constant 0 : index
      %43 = vector.load %arg5[%c0_17, %c0_18] : memref<8x5xf32, #tpu.memory_space<vmem>>, vector<8x5xf32>
      tpu.vector_store %arg5[%c0_17, %c0_18], %42 {strides = array<i32>} : memref<8x5xf32, #tpu.memory_space<vmem>>, vector<8x5xf32>,
    } else {
    }
    return
  }
  func.func @transform_0(%arg0: i32, %arg1: i32) -> (i32, i32) {
    %c0_i32 = arith.constant 0 : i32
    return %arg0, %arg1 : i32, i32
  }
  func.func @transform_1(%arg0: i32, %arg1: i32) -> (i32, i32) {
    %c0_i32 = arith.constant 0 : i32
    %c0_i32_0 = arith.constant 0 : i32
    return %c0_i32, %arg1 : i32, i32
  }
  func.func @transform_2(%arg0: i32, %arg1: i32) -> (i32, i32) {
    %c0_i32 = arith.constant 0 : i32
    %c0_i32_0 = arith.constant 0 : i32
    %c0_i32_1 = arith.constant 0 : i32
    return %c0_i32, %c0_i32_0 : i32, i32
  }
  func.func @transform_3(%arg0: i32, %arg1: i32) -> (i32, i32) {
    %c0_i32 = arith.constant 0 : i32
    %c0_i32_0 = arith.constant 0 : i32
    return %arg0, %c0_i32 : i32, i32
  }
}

</mosaic_0001>

<bundles_post_ra>
// kernel: tpu_custom_call.1
= control target key start
LH: loop header
LB: loop body
LE: loop exit
PB: predicated region body
PF: predicated region fallthrough
CT: control target
= control target key end

     0   :  { %s968_s0 = inlined_call_operand.hbm [shape: f32[10,400], index: 0, kind: input, shape index: {}]   ;;  %s969_s1 = inlined_call_operand.hbm [shape: bf16[5,400], index: 1, kind: input, shape index: {}]   ;;  %s970_s2 = inlined_call_operand.vmem [shape: f32[1,5], index: 2, kind: input, shape index: {}]   ;;  %s971_s3 = inlined_call_operand.vmem [shape: f32[16,5], index: 3, kind: output, shape index: {}]  }
   0x1   :  { %976 = sst [smem:[#allocation11_spill]] %s970_s2 }
   0x2   :  { %8 = vsyncpa [#allocation4], 0 }
   0x3   :  { %10 = vsyncpa [#allocation4 + $0x1], 0 }
   0x4   :  { %11 = vsyncpa [#allocation6], 0 }
   0x5   :  { %13 = vsyncpa [#allocation6 + $0x1], 0  ;;  %s745_s12 = smov 0   ;;  %s747_s13 = smov 0  }
   0x6   :  { %s749_s14 = smov 0   ;;  %s751_s15 = smov 0  }
   0x7   :  { %s753_s16 = smov 0   ;;  %s755_s17 = smov 0  }
   0x8   :  { %s757_s18 = smov 0   ;;  %s759_s19 = smov 0  }
   0x9   :  { %s761_s20 = smov 0   ;;  %s763_s21 = smov 0  }
   0xa   :  { %s765_s22 = smov 0  }
   0xb LB: > { %977 = sst [smem:[#allocation9_spill]] %s702_s18  ;;  %s431_s23 = sadd.s32 4294967295, %s718_s22   ;;  %s718_s22 = sphi %s765_s22, %s19_s22   ;;  %s714_s21 = sphi %s763_s21, %s1001_s21   ;;  %s710_s20 = sphi %s761_s20, %s1000_s20   ;;  %s706_s19 = sphi %s759_s19, %s999_s19   ;;  %s702_s18 = sphi %s757_s18, %s998_s18   ;;  %s698_s17 = sphi %s755_s17, %s997_s17   ;;  %s694_s16 = sphi %s753_s16, %s996_s16   ;;  %s690_s15 = sphi %s751_s15, %s995_s15   ;;  %s686_s14 = sphi %s749_s14, %s994_s14   ;;  %s682_s13 = sphi %s747_s13, %s993_s13   ;;  %s678_s12 = sphi %s745_s12, %s992_s12  }
   0xc   : > { %s28_s24 = sadd.s32 1, %s710_s20  ;;  %s31_s25 = sadd.s32 1, %s714_s21 }
   0xd   : > { %p29_p0 = scmp.ge.s32.totalorder %s28_s24, 4  ;;  %s40_s26 = sadd.s32 1, %s698_s17 }
   0xe   : > { %p47_p1 = scmp.ne.s32.totalorder %s698_s17, %s694_s16  ;;  %p974_p2 = scmp.eq.s32.totalorder %s718_s22, 0 }
   0xf   : > { %s1003_s24 = smov (%p29_p0, %s28_s24), 0  ;;  %s1005_s25 = smov (!%p29_p0, %s31_s25), %s714_s21 }
  0x10   : > { %978 = sst [smem:[#allocation10_spill]] %s1003_s24  ;;  %s809_s27 = ssub.s32 %s710_s20, %s1003_s24 }
  0x11   : > { %p33_p3 = scmp.ge.s32.totalorder %s1005_s25, 2  ;;  %p53_p4 = scmp.ne.s32.totalorder %s694_s16, %s690_s15 }
  0x12   : > { %p815_p5 = por %p974_p2, %p47_p1  ;;  %p819_p6 = scmp.eq.s32.totalorder %s431_s23, 0 }
  0x13   : > { %s1007_s25 = smov (%p33_p3, %s1005_s25), 0  ;;  %p64_p8 = scmp.eq.s32.totalorder %s809_s27, 0 }
  0x14   : > { %p827_p7 = por %p819_p6, %p53_p4  ;;  %s35_s4 = ssub.s32 %s714_s21, %s1007_s25 }
  0x15   : > { %s37_s5 = sor.u32 %s809_s27, %s35_s4  ;;  %p975_p9 = scmp.lt.s32.totalorder %s718_s22, 8 }
  0x16   : > { %p38_p10 = scmp.eq.s32.totalorder %s37_s5, 0  ;;  %s153_s6 = sand.u32 1, %s698_s17  }
  0x17   : > { %s435_s7 = sshll.u32 %s153_s6, 3  ;;  %s436_s9 = sshll.u32 %s714_s21, 2 }
  0x18   : > { %s838_s8 = scalar_select %p38_p10, %s698_s17, %s40_s26  }
  0x19   : > { %s162_s10 = sadd.s32 %s710_s20, %s436_s9  ;;  %s157_s11 = scalar_lea.vmem [#allocation3], %s435_s7 }
  0x1a   : > { %s166_s15 = sshll.u32 %s157_s11, 4  ;;  %s437_s23 = sshll.u32 %s162_s10, 7  ;;  %s167_s15 = int_to_ptr.vmem [resolvable:$true] %s166_s15 }
  0x1b   : > { %s164_s18 = scalar_lea.hbm %s968_s0, %s437_s23  ;;  %p849_p11 = pnand %p975_p9, %p815_p5 }
  0x1c   : > { %p440_p12 = scmp.ge.s32.totalorder %s718_s22, 1  ;;  %p189_p13 = scmp.lt.s32.totalorder %s718_s22, 9 }
  0x1d   : > { %s154_s26 = scalar_lea.sflag [#allocation4], %s153_s6  ;;  %p570_p0 = pneg %p849_p11 }
  0x1e   : > { %s581_s5 = scalar_lea.vmem %s167_s15, 128  ;;  %s720_s7 = smov [#allocation3]  }
  0x1f   : > { %p582_p1 = scmp.ne.s32.totalorder %s167_s15, %s581_s5  ;;  %s586_s9 = sshll.u32 %s720_s7, 4  ;;  %s587_s9 = int_to_ptr.vmem [resolvable:$false] %s586_s9 }
  0x20   : > { %s588_s2 = scalar_lea.vmem %s587_s9, 256  ;;  %p589_p10 = scmp.lt.s32.totalorder %s167_s15, %s587_s9 }
  0x21   : > { %p584_p3 = pnand %p582_p1, %p570_p0  ;;  %p590_p2 = scmp.lt.s32.totalorder %s588_s2, %s581_s5 }
  0x23   : > { %p585_p4 = pneg %p584_p3  ;;  %p591_p5 = por %p590_p2, %p589_p10 }
  0x25   : > { %p592_p9 = pnand %p591_p5, %p585_p4 }
  0x27   : > { %595 = shalt.err (!%p592_p9)
}
  0x28   : > { %468 = dma.hbm_to_vmem [thread:$0]  (!%p849_p11), %s164_s18, 128, %s167_s15, %s154_s26  }
  0x29   : > { %p863_p2 = pnand %p440_p12, %p189_p13  ;;  %s66_s28 = sadd.s32 1, %s686_s14 }
  0x2a   : > { %p73_p9 = scmp.ne.s32.totalorder %s686_s14, %s682_s13  ;;  %p984_p0 = scmp.eq.s32.totalorder %s718_s22, 0 }
  0x2b   : > { %s873_s6 = scalar_select %p64_p8, %s686_s14, %s66_s28  }
  0x2c   : > { %p75_p1 = por %p73_p9, %p984_p0  ;;  %p79_p3 = scmp.ne.s32.totalorder %s682_s13, %s678_s12 }
  0x2d   : > { %s173_s10 = sand.u32 1, %s686_s14   ;;  %s439_s11 = sshll.u32 %s710_s20, 6 }
  0x2e   : > { %p883_p4 = por %p79_p3, %p819_p6  ;;  %s438_s18 = sshll.u32 %s173_s10, 2 }
  0x2f   : > { %s182_s26 = scalar_lea.hbm %s969_s1, %s439_s11  ;;  %p986_p11 = scmp.lt.s32.totalorder %s718_s22, 8 }
  0x30   : > { %s177_s5 = scalar_lea.vmem [#allocation5], %s438_s18  ;;  %s174_s7 = scalar_lea.sflag [#allocation6], %s173_s10 }
  0x31   : > { %p892_p12 = pnand %p986_p11, %p75_p1  ;;  %s184_s12 = sshll.u32 %s177_s5, 4  ;;  %s185_s12 = int_to_ptr.vmem [resolvable:$true] %s184_s12 }
  0x32   : > { %s609_s29 = scalar_lea.vmem %s185_s12, 64  ;;  %s721_s9 = smov [#allocation5]  }
  0x33   : > { %p598_p6 = pneg %p892_p12  ;;  %p610_p8 = scmp.ne.s32.totalorder %s185_s12, %s609_s29 }
  0x34   : > { %s614_s2 = sshll.u32 %s721_s9, 4  ;;  %s615_s2 = int_to_ptr.vmem [resolvable:$false] %s614_s2 }
  0x35   : > { %p612_p13 = pnand %p610_p8, %p598_p6  ;;  %s616_s28 = scalar_lea.vmem %s615_s2, 128 }
  0x36   : > { %p617_p5 = scmp.lt.s32.totalorder %s185_s12, %s615_s2  ;;  %p618_p9 = scmp.lt.s32.totalorder %s616_s28, %s609_s29 }
  0x37   : > { %p613_p10 = pneg %p612_p13 }
  0x38   : > { %p619_p0 = por %p618_p9, %p617_p5 }
  0x3a   : > { %p620_p1 = pnand %p619_p0, %p613_p10 }
  0x3c   : > { %623 = shalt.err (!%p620_p1)
}
  0x3d   : > { %471 = dma.hbm_to_vmem [thread:$0]  (!%p892_p12), %s182_s26, 64, %s185_s12, %s174_s7  }
  0x3e   : > { %193 = sbr.rel (%p863_p2) target bundleno = 627 (0x273), region = 32  ;;  %s195_s10 = sand.u32 (!%p863_p2), 1, %s694_s16  }
  0x3f   : > { %s903_s11 = sshll.u32 (!%p863_p2), %s195_s10, 3  ;;  %s196_s18 = scalar_lea.sflag (!%p863_p2), [#allocation4], %s195_s10 }
  0x40   : > { %s199_s15 = scalar_lea.vmem (!%p863_p2), [#allocation3], %s903_s11 }
  0x43   : > { %669 = dma.done.wait (%p827_p7), %s196_s18, 128  }
  0x44   : > { %671 = vsyncadd (%p827_p7), %s196_s18, 4294967168  ;;  %s204_s4 = sand.u32 1, %s682_s13  }
  0x45   : > { %s442_s26 = sshll.u32 %s204_s4, 2  ;;  %s205_s27 = scalar_lea.sflag [#allocation6], %s204_s4 }
  0x46   : > { %s208_s24 = scalar_lea.vmem [#allocation5], %s442_s26 }
  0x47   : > { %673 = dma.done.wait (%p883_p4), %s205_s27, 64  }
  0x48   : > { %675 = vsyncadd (%p883_p4), %s205_s27, 4294967232  ;;  %p235_p2 = scmp.lt.s32.totalorder %s706_s19, 1  ;;  %s988_s29 = sld [smem:[#allocation9_spill]] }
  0x4a   : > { %s1009_s19 = smov (!%p235_p2, %s706_s19), 1 }
  0x4b   : > { %s443_s5 = sshll.u32 %s1009_s19, 3 }
  0x4c   : > { %s920_s30 = scalar_lea.vmem %s971_s3, %s443_s5 }
  0x4e   : > { %p444_p7 = scmp.ne.s32.totalorder %s988_s29, 0 }
  0x50   : > { %243 = sbr.rel (%p444_p7) target bundleno = 87 (0x57), region = 44 }
  0x55   : > { %vm244_vm0 = vcmask 39936   ;;  %v722_v0 = vmov 0.0  }
  0x56   : > { %245 = vst.msk [vmem:[#allocation2] sm:$0xff] %vm244_vm0, %v722_v0 }
  0x57 PF: > { %v248_v1 = vlaneseq  ;;  %s989_s23 = sld [smem:[#allocation9_spill]]  ;;  %v723_v2 = vmov 0.0   ;;  %vm724_vm1 = vmmov 0   ;;  %v247_v6 = vld [vmem:[%s208_s24] sm:$0x7]  ;;  %v246_v8 = vld [vmem:[%s199_s15] sm:$0xff] }
  0x58   : > { %455 = vmatprep.subr.bf16.mxu0 %v723_v2  ;;  %457 = vmatprep.mubr.msk.bf16.mxu0 %vm724_vm1, %v723_v2  ;;  %v447_v9 = vpack.c.bf16 %v246_v8, %v246_v8  ;;  %vm302_vm4 = vcmask 39936  }
  0x59   : > { %v249_v4 = vand.u32 127, %v248_v1 }
  0x5d   : > { %s445_s9 = sshll.u32 %s989_s23, 7  ;;  %v259_v10 = vld [vmem:[#allocation2] sm:$0xff]  ;;  %p449_p3 = scmp.ne.s32.totalorder %s989_s23, 3 }
  0x5e   : > { %v251_v3 = vstv %s445_s9  ;;  %s990_s28 = sld [smem:[#allocation11_spill]] (!%p449_p3) }
  0x5f   : > { %v252_v5 = vadd.s32 %v251_v3, %v249_v4 }
  0x61   : > { %vm253_vm2 = vcmp.lt.s32.totalorder %v252_v5, 400 }
  0x62   : > { %vm257_vm3 = vmpackc.low %vm253_vm2, %vm253_vm2 }
  0x63   : > { %v258_v7 = vsel %vm257_vm3, %v247_v6, 0 }
  0x64   : > { %456 = vmatpush3.bf16.xpose.msra.mxu0 %v258_v7 }
  0x6b   : > { %458 = vmatmul.mubr.msk.bf16.vlgmr.msra.gmra.mxu0 %vm257_vm3, %v447_v9 }
 0x12b   : > { %v295_v11 = vpop.f32.mrf.mxu0 }
 0x12c   : > { %v301_v12 = vadd.f32 %v295_v11, %v259_v10 }
 0x12d   : > { %v459_v13 = vpop.f32.mrf.mxu0  ;;  %307 = sbr.rel (%p449_p3) target bundleno = 627 (0x273), region = 48 }
 0x12e   : > { %303 = vst.msk [vmem:[#allocation2] sm:$0xff] %vm302_vm4, %v301_v12 }
 0x12f   : > { %v298_v14 = vpop.f32.mrf.mxu0 }
 0x131   : > { %v460_v15 = vpop.f32.mrf.mxu0 }
 0x132   : > { %v450_v17 = vld [vmem:[%s990_s28] ss:$0 sm:$0xff] }
 0x135   : > { %v308_v16 = vld [vmem:[#allocation2] sm:$0xff] }
 0x136   : > { %v316_v18 = vadd.f32 %v450_v17, %v308_v16 }
 0x138   : > { %v317_v19 = vsel %vm302_vm4, %v316_v18, -inf }
 0x139   : > { %318 = vmax.xlane.f32.xlu0 %v317_v19 }
 0x1c2   : > { %v319_v20 = vpop.xlane.xlu0 %318 }
 0x1c3   : > { %v320_v21 = vsub.f32 %v316_v18, %v319_v20 }
 0x1c5   : > { %v321_v22 = vmul.f32 1.442695, %v320_v21 }
 0x1c7   : > { %564 = vpow2.f32 %v321_v22 }
 0x1d4   : > { %v565_v23 = vpop.eup %564 }
 0x1d5   : > { %v323_v24 = vsel %vm302_vm4, %v565_v23, 0.0 }
 0x1d6   : > { %324 = vadd.xlane.f32.xlu0 %v323_v24 }
 0x25f   : > { %v325_v25 = vpop.xlane.xlu0 %324 }
 0x260   : > { %566 = vlog2.f32 %v325_v25 }
 0x26d   : > { %v567_v26 = vpop.eup %566 }
 0x26e   : > { %v327_v27 = vmul.f32 0.6931472, %v567_v26 }
 0x270   : > { %v328_v28 = vsub.f32 %v320_v21, %v327_v27 }
 0x272   : > { %329 = vst.msk [vmem:[%s920_s30] sm:$0xff] %vm302_vm4, %v328_v28 }
 0x273 PF: > { %s19_s22 = sadd.s32 1, %s718_s22   ;;  %s991_s10 = sld [smem:[#allocation10_spill]] }
 0x274   : > { %p16_p4 = scmp.ge.s32.totalorder %s19_s22, 10   ;;  %s992_s12 = smov %s682_s13 }
 0x275   : > { %s993_s13 = smov %s686_s14  ;;  %s994_s14 = smov %s873_s6 }
 0x276   : > { %s995_s15 = smov %s694_s16  ;;  %s996_s16 = smov %s698_s17 }
 0x277   : > { %s997_s17 = smov %s838_s8  ;;  %s998_s18 = smov %s710_s20 }
 0x278   : > { %s999_s19 = smov %s714_s21  ;;  %s1001_s21 = smov %s1007_s25 }
 0x279   : > { %s1000_s20 = smov %s991_s10  ;;  %18 = sbr.rel (!%p16_p4) target bundleno = 11 (0xb), region = 93 }
 0x27e   :  { %349 = vsyncpa [#allocation4], 1 }
 0x27f   :  { %351 = vsyncpa [#allocation4 + $0x1], 1 }
 0x280   :  { %352 = vsyncpa [#allocation6], 1 }
 0x281   :  { %354 = vsyncpa [#allocation6 + $0x1], 1 }

</bundles_post_ra>
